<compile_context>
chip_gen: v7x
topology: tpu7x:2x2x1
jax: 0.10.0
libtpu: 0.0.40
codegen_flags: <defaults>
</compile_context>

<pallas_src>
import functools
import math

import jax
import jax.numpy as jnp
from jax.experimental import pallas as pl
from jax.experimental.pallas import tpu as pltpu

# Raw tile bytes per pipeline stage for the VMEM-staged (narrow-width) path.
# Double-buffering makes the resident footprint ~2x this.
_VMEM_DATA_BUDGET = 8 * 1024 * 1024
_MAX_ROW_TILE = 8192
# Below this output size XLA's fused concatenate beats a pallas_call launch
# (break-even grows with HBM BW; 512 KiB also covers v7x at 3.2 TB/s).
_PALLAS_MIN_BYTES = 512 * 1024
# Per-row contiguous run needed for the HBM->HBM DMA path to run at roofline.
_DMA_MIN_ROW_BYTES = 512


def _sublane_pack(dtype):
    # rows per packed sublane group: f32 -> 8, bf16 -> 16, int8/fp8 -> 32
    return {1: 32, 2: 16}.get(jnp.dtype(dtype).itemsize, 8)


@functools.lru_cache(maxsize=1)
def _vmem_limit_bytes():
    # Generation-aware scoped-VMEM request: never more than half the physical
    # VMEM (v7x only has 64 MiB) and never more than 48 MiB (ample headroom
    # above the ~16 MiB double-buffered working set on v5e/v6e).
    try:
        cap = int(pltpu.get_tpu_info().vmem_capacity_bytes)
    except Exception:  # non-TPU backend / older jax: assume 128 MiB class
        cap = 128 * 1024 * 1024
    return int(min(48 * 1024 * 1024, max(cap // 2, 16 * 1024 * 1024)))


def _pick_row_tile(rows, bytes_per_row, dtype):
    """Sublane-aligned row tile; None if even a minimal tile blows the budget."""
    pack = _sublane_pack(dtype)
    cap = _VMEM_DATA_BUDGET // max(bytes_per_row, 1)
    cap = min(cap, _MAX_ROW_TILE)
    if cap < pack:
        return None
    if rows <= pack:
        return int(rows)
    cap = (cap // pack) * pack
    # v7x megacore: force >= 2 balanced grid steps so "parallel" feeds both
    # TensorCores; on 1-TC v5e/v6e the extra ~0.35us step is noise.
    num_steps = max(2, -(-rows // cap))
    tile = -(-rows // num_steps)
    tile = -(-tile // pack) * pack
    return int(min(tile, cap))


def _make_vmem_concat_kernel(widths):
    """Row-tiled concat: per-slab stores split at 128-lane-aligned column
    offsets (aligned slabs -> direct lane-dense stores); only narrow or
    unaligned runs are concatenated in registers before their single store."""
    n = len(widths)
    groups, start, members, off = [], 0, [], 0
    for i, w in enumerate(widths):
        members.append(i)
        off += w
        if off % 128 == 0 or i == n - 1:
            groups.append((start, off - start, tuple(members)))
            start, members = off, []

    def kernel(*refs):
        out_ref = refs[n]
        for g_off, g_w, idxs in groups:
            if len(idxs) == 1:
                val = refs[idxs[0]][...]
            else:
                val = jnp.concatenate([refs[j][...] for j in idxs], axis=-1)
            out_ref[:, g_off:g_off + g_w] = val

    return kernel


def _make_dma_concat_kernel(n, col_offsets, widths):
    """Pure HBM->HBM copy: one (possibly strided) DMA per input into its
    static column slab of the output; start all, then wait all."""
    def kernel(*refs):
        out_ref = refs[n]
        sem = refs[n + 1]
        copies = []
        for i, (off, w) in enumerate(zip(col_offsets, widths)):
            cp = pltpu.make_async_copy(refs[i], out_ref.at[:, off:off + w],
                                       sem.at[i])
            cp.start()
            copies.append(cp)
        for cp in copies:
            cp.wait()

    return kernel


def _dma_concat_2d(xs2d, widths, prefix, dtype):
    n = len(xs2d)
    w_total = sum(widths)
    offsets = [0]
    for w in widths[:-1]:
        offsets.append(offsets[-1] + w)
    return pl.pallas_call(
        _make_dma_concat_kernel(n, offsets, widths),
        out_shape=jax.ShapeDtypeStruct((prefix, w_total), dtype),
        in_specs=[pl.BlockSpec(memory_space=pl.ANY)] * n,
        out_specs=pl.BlockSpec(memory_space=pl.ANY),
        scratch_shapes=[pltpu.SemaphoreType.DMA((n,))],
    )(*xs2d)


def _vmem_concat_2d(xs2d, widths, prefix, dtype, tile_r):
    w_total = sum(widths)
    grid = (pl.cdiv(prefix, tile_r),)
    return pl.pallas_call(
        _make_vmem_concat_kernel(widths),
        out_shape=jax.ShapeDtypeStruct((prefix, w_total), dtype),
        grid=grid,
        in_specs=[pl.BlockSpec((tile_r, w), lambda i: (i, 0)) for w in widths],
        out_specs=pl.BlockSpec((tile_r, w_total), lambda i: (i, 0)),
        compiler_params=pltpu.CompilerParams(
            dimension_semantics=("parallel",),
            vmem_limit_bytes=_vmem_limit_bytes(),
        ),
    )(*xs2d)


def pallas_concat(xs, dim, *, min_pallas_bytes=_PALLAS_MIN_BYTES):
    """Equivalent of Concat(dim)(*xs): drops None entries, concatenates the rest."""
    xs = [x for x in xs if x is not None]
    assert len(xs) > 0, "Concat needs at least one non-None input"
    if len(xs) == 1:
        return xs[0]

    dtype = xs[0].dtype
    ndim = xs[0].ndim
    assert all(x.dtype == dtype for x in xs), "torch.cat requires identical dtypes"
    assert all(x.ndim == ndim for x in xs)
    d = dim if dim >= 0 else dim + ndim
    assert 0 <= d < ndim
    for x in xs:
        assert (x.shape[:d] == xs[0].shape[:d]
                and x.shape[d + 1:] == xs[0].shape[d + 1:]), \
            "non-concat dims must match"

    out_shape = list(xs[0].shape)
    out_shape[d] = sum(int(x.shape[d]) for x in xs)
    out_shape = tuple(out_shape)

    # Drop zero-width inputs (they contribute nothing to the output).
    xs = [x for x in xs if x.shape[d] != 0]
    if not xs:
        return jnp.zeros(out_shape, dtype)
    if len(xs) == 1:
        return xs[0]

    itemsize = jnp.dtype(dtype).itemsize
    out_bytes = int(math.prod(out_shape)) * itemsize
    if out_bytes < min_pallas_bytes:
        # Tiny copies: kernel launch + pipeline prologue dwarf the actual copy.
        return jnp.concatenate(xs, axis=d)

    # Collapse to a 2D "row concat": concat along dim d of contiguous arrays
    # is a last-axis concat of the free views x_i.reshape(prefix, C_i*suffix).
    sizes = [int(x.shape[d]) for x in xs]
    prefix = int(math.prod(xs[0].shape[:d]))
    suffix = int(math.prod(xs[0].shape[d + 1:]))
    widths = [c * suffix for c in sizes]
    w_total = sum(widths)
    xs2d = [x.reshape(prefix, w) for x, w in zip(xs, widths)]

    # Path A: pure HBM->HBM DMA copy. Used when every per-row contiguous run
    # is wide enough for the DMA engine, or when prefix == 1 (dim-0 style
    # concat is a fully contiguous stacking copy).  Word-aligned boundaries
    # only, to keep the strided DMA windows simple.
    dma_ok = all((w * itemsize) % 4 == 0 for w in widths) and (
        prefix == 1 or all(w * itemsize >= _DMA_MIN_ROW_BYTES for w in widths))
    if dma_ok:
        out2d = _dma_concat_2d(xs2d, widths, prefix, dtype)
        return out2d.reshape(out_shape)

    # Path B: VMEM-staged, row-tiled, BlockSpec-pipelined copy (narrow widths).
    bytes_per_row = 2 * w_total * itemsize   # inputs + output per row
    tile_r = _pick_row_tile(prefix, bytes_per_row, dtype)
    if tile_r is None:
        # TODO(synk): mixed very-wide + unaligned-narrow inputs would need a
        # lane-tiled grid with per-input index maps; fall back to XLA instead
        # of risking a VMEM OOM.
        return jnp.concatenate(xs, axis=d)
    out2d = _vmem_concat_2d(xs2d, widths, prefix, dtype, tile_r)
    return out2d.reshape(out_shape)


class Concat:
    """Thin JAX wrapper mirroring the PyTorch module's interface."""

    def __init__(self, dim):
        self.dim = dim

    def __call__(self, *x):
        return pallas_concat(list(x), self.dim)


if __name__ == "__main__":
    key = jax.random.PRNGKey(0)
    k1, k2, k3, k4, k5 = jax.random.split(key, 5)

    # 1) Module-scale shapes (B=2, S=8, hidden 32/16/8), dim=-1, with a None
    #    input, forced through the narrow-width VMEM kernel path.
    B, S = 2, 8
    a = jax.random.normal(k1, (B, S, 32), dtype=jnp.float32)
    b = jax.random.normal(k2, (B, S, 16), dtype=jnp.float32)
    c = jax.random.normal(k3, (B, S, 8), dtype=jnp.float32)
    out1 = jax.block_until_ready(pallas_concat([a, None, b, c], dim=-1,
                                               min_pallas_bytes=0))
    assert out1.shape == (B, S, 56), out1.shape
    assert jnp.array_equal(out1, jnp.concatenate([a, b, c], axis=-1)), "dim=-1 small"

    # 2) Larger dim=-1 concat via the default Concat path -> HBM->HBM DMA.
    d2 = jax.random.normal(k4, (2, 600, 256), dtype=jnp.float32)
    e2 = jax.random.normal(k5, (2, 600, 512), dtype=jnp.float32)
    out2 = jax.block_until_ready(Concat(dim=-1)(d2, None, e2))
    assert out2.shape == (2, 600, 768), out2.shape
    assert jnp.array_equal(out2, jnp.concatenate([d2, e2], axis=-1)), "dim=-1 large"

    # 3) Middle-dim concat (dim=1), wide rows -> DMA path with strided dst.
    f3 = jax.random.normal(k1, (2, 8, 16), dtype=jnp.float32)
    g3 = jax.random.normal(k2, (2, 24, 16), dtype=jnp.float32)
    out3 = jax.block_until_ready(pallas_concat([f3, g3], dim=1, min_pallas_bytes=0))
    assert out3.shape == (2, 32, 16), out3.shape
    assert jnp.array_equal(out3, jnp.concatenate([f3, g3], axis=1)), "dim=1"

    # 4) dim=0 concat (prefix == 1): fully contiguous stacking via DMA path.
    h4 = jax.random.normal(k3, (3, 8, 32), dtype=jnp.float32)
    i4 = jax.random.normal(k4, (5, 8, 32), dtype=jnp.float32)
    out4 = jax.block_until_ready(pallas_concat([h4, i4], dim=0, min_pallas_bytes=0))
    assert out4.shape == (8, 8, 32), out4.shape
    assert jnp.array_equal(out4, jnp.concatenate([h4, i4], axis=0)), "dim=0"

    # 5) Narrow bf16 widths, many rows -> multi-step balanced VMEM grid.
    j5 = jax.random.normal(k5, (4, 1000, 8), dtype=jnp.bfloat16)
    l5 = jax.random.normal(k1, (4, 1000, 24), dtype=jnp.bfloat16)
    out5 = jax.block_until_ready(pallas_concat([j5, l5], dim=2, min_pallas_bytes=0))
    assert out5.shape == (4, 1000, 32), out5.shape
    assert jnp.array_equal(out5, jnp.concatenate([j5, l5], axis=2)), "bf16 narrow"

    # 6) Mixed wide + narrow widths -> VMEM path with a 128-lane-aligned
    #    direct slab store for the wide input and a tail store for the narrow.
    m6 = jax.random.normal(k2, (2, 512, 128), dtype=jnp.float32)
    n6 = jax.random.normal(k3, (2, 512, 8), dtype=jnp.float32)
    out6 = jax.block_until_ready(pallas_concat([m6, n6], dim=-1, min_pallas_bytes=0))
    assert out6.shape == (2, 512, 136), out6.shape
    assert jnp.array_equal(out6, jnp.concatenate([m6, n6], axis=-1)), "mixed widths"

    print("KERNEL_OK")
</pallas_src>

<mosaic_0001>
module attributes {stable_mosaic.version = 11 : i64} {
  func.func @kernel(%arg0: i32, %arg1: memref<8x32xf32, #tpu.memory_space<vmem>>, %arg2: memref<8x16xf32, #tpu.memory_space<vmem>>, %arg3: memref<8x8xf32, #tpu.memory_space<vmem>>, %arg4: memref<8x56xf32, #tpu.memory_space<vmem>>) attributes {dimension_semantics = [#tpu.dimension_semantics<parallel>], iteration_bounds = array<i64: 2>, scalar_prefetch = 0 : i64, scratch_operands = 0 : i64, tpu.core_type = #tpu.core_type<tc>, window_params = [{transform_indices = @transform_0, window_bounds = array<i64: 8, 32>}, {transform_indices = @transform_1, window_bounds = array<i64: 8, 16>}, {transform_indices = @transform_2, window_bounds = array<i64: 8, 8>}, {transform_indices = @transform_3, window_bounds = array<i64: 8, 56>}]} {
    %c0 = arith.constant 0 : index
    %c0_0 = arith.constant 0 : index
    %0 = vector.load %arg1[%c0, %c0_0] : memref<8x32xf32, #tpu.memory_space<vmem>>, vector<8x32xf32>
    %c0_1 = arith.constant 0 : index
    %c0_2 = arith.constant 0 : index
    %1 = vector.load %arg2[%c0_1, %c0_2] : memref<8x16xf32, #tpu.memory_space<vmem>>, vector<8x16xf32>
    %c0_3 = arith.constant 0 : index
    %c0_4 = arith.constant 0 : index
    %2 = vector.load %arg3[%c0_3, %c0_4] : memref<8x8xf32, #tpu.memory_space<vmem>>, vector<8x8xf32>
    %3 = tpu.concatenate %0, %1, %2 in 1 : vector<8x32xf32>, vector<8x16xf32>, vector<8x8xf32> -> vector<8x56xf32>
    %c0_5 = arith.constant 0 : index
    %c0_6 = arith.constant 0 : index
    %4 = vector.load %arg4[%c0_5, %c0_6] : memref<8x56xf32, #tpu.memory_space<vmem>>, vector<8x56xf32>
    tpu.vector_store %arg4[%c0_5, %c0_6], %3 {strides = array<i32>} : memref<8x56xf32, #tpu.memory_space<vmem>>, vector<8x56xf32>,
    return
  }
  func.func @transform_0(%arg0: i32) -> (i32, i32) {
    %c0_i32 = arith.constant 0 : i32
    %c0_i32_0 = arith.constant 0 : i32
    return %arg0, %c0_i32 : i32, i32
  }
  func.func @transform_1(%arg0: i32) -> (i32, i32) {
    %c0_i32 = arith.constant 0 : i32
    %c0_i32_0 = arith.constant 0 : i32
    return %arg0, %c0_i32 : i32, i32
  }
  func.func @transform_2(%arg0: i32) -> (i32, i32) {
    %c0_i32 = arith.constant 0 : i32
    %c0_i32_0 = arith.constant 0 : i32
    return %arg0, %c0_i32 : i32, i32
  }
  func.func @transform_3(%arg0: i32) -> (i32, i32) {
    %c0_i32 = arith.constant 0 : i32
    %c0_i32_0 = arith.constant 0 : i32
    return %arg0, %c0_i32 : i32, i32
  }
}

</mosaic_0001>

<bundles_post_ra>
// kernel: tpu_custom_call.1
= control target key start
LH: loop header
LB: loop body
LE: loop exit
PB: predicated region body
PF: predicated region fallthrough
CT: control target
= control target key end

     0   :  { %8 = vsyncpa [#allocation3], 0  ;;  %s698_s0 = inlined_call_operand.vmem [shape: f32[16,32], index: 0, kind: input, shape index: {}]   ;;  %s699_s1 = inlined_call_operand.hbm [shape: f32[16,16], index: 1, kind: input, shape index: {}]   ;;  %s700_s2 = inlined_call_operand.vmem [shape: f32[16,8], index: 2, kind: input, shape index: {}]   ;;  %s701_s3 = inlined_call_operand.hbm [shape: f32[16,56], index: 3, kind: output, shape index: {}]  }
   0x1   :  { %10 = vsyncpa [#allocation3 + $0x1], 0 }
   0x2   :  { %11 = vsyncpa [#allocation4], 0 }
   0x3   :  { %13 = vsyncpa [#allocation4 + $0x1], 0  ;;  %s529_s12 = smov 0   ;;  %s531_s13 = smov 0  }
   0x4   :  { %s533_s14 = smov 0   ;;  %s535_s15 = smov 0  }
   0x5 LB: > { %s550_s16 = sadd.s32 4294967295, %s503_s15   ;;  %s345_s17 = sadd.s32 4294967294, %s503_s15   ;;  %s503_s15 = sphi %s535_s15, %s716_s15   ;;  %s499_s14 = sphi %s533_s14, %s715_s14   ;;  %s495_s13 = sphi %s531_s13, %s714_s13   ;;  %s491_s12 = sphi %s529_s12, %s713_s12  }
   0x6   : > { %s554_s18 = sadd.s32 1, %s503_s15   ;;  %s52_s19 = sadd.s32 1, %s499_s14 }
   0x7   : > { %s49_s20 = ssub.s32 %s503_s15, %s554_s18  ;;  %p59_p0 = scmp.ne.s32.totalorder %s499_s14, %s495_s13 }
   0x8   : > { %p50_p1 = scmp.eq.s32.totalorder %s49_s20, 0  ;;  %p60_p2 = scmp.eq.s32.totalorder %s503_s15, 0 }
   0x9   : > { %p65_p3 = scmp.ne.s32.totalorder %s495_s13, %s491_s12  ;;  %p66_p4 = scmp.eq.s32.totalorder %s550_s16, 0 }
   0xa   : > { %s566_s21 = scalar_select %p50_p1, %s499_s14, %s52_s19  }
   0xb   : > { %p568_p5 = por %p60_p2, %p59_p0  ;;  %p572_p6 = por %p66_p4, %p65_p3 }
   0xc   : > { %p115_p7 = scmp.eq.s32.totalorder %s550_s16, 1  ;;  %p121_p8 = scmp.eq.s32.totalorder %s345_s17, 1 }
   0xd   : > { %p371_p10 = scmp.lt.s32.totalorder %s503_s15, 2  ;;  %s148_s26 = sand.u32 1, %s499_s14  }
   0xe   : > { %p579_p11 = por %p115_p7, %p59_p0  ;;  %p583_p12 = por %p121_p8, %p65_p3 }
   0xf   : > { %s349_s27 = sshll.u32 %s503_s15, 7  ;;  %s348_s28 = sshll.u32 %s148_s26, 3 }
  0x10   : > { %s705_s24 = scalar_select %p579_p11, 1, 0 }
  0x11   : > { %s706_s25 = scalar_select %p583_p12, 1, 0 }
  0x12   : > { %s592_s4 = scalar_lea.hbm %s699_s1, %s349_s27  ;;  %s152_s5 = scalar_lea.vmem [#allocation2], %s348_s28 }
  0x13   : > { %s159_s6 = sshll.u32 %s152_s5, 4  ;;  %p596_p13 = pnand %p371_p10, %p568_p5  ;;  %s600_s6 = int_to_ptr.vmem [resolvable:$true] %s159_s6 }
  0x14   : > { %s149_s8 = scalar_lea.sflag [#allocation3], %s148_s26  ;;  %s407_s9 = scalar_lea.hbm %s592_s4, 128 }
  0x15   : > { %p408_p2 = scmp.ne.s32.totalorder %s592_s4, %s407_s9  ;;  %p409_p3 = pneg %p596_p13 }
  0x16   : > { %s412_s17 = scalar_lea.hbm %s699_s1, 256  ;;  %p413_p5 = scmp.lt.u32.totalorder %s592_s4, %s699_s1 }
  0x17   : > { %p410_p4 = pnand %p409_p3, %p408_p2  ;;  %p414_p8 = scmp.lt.u32.totalorder %s412_s17, %s407_s9 }
  0x18   : > { %p416_p9 = scmp.lt.u32.totalorder %s407_s9, %s592_s4 }
  0x19   : > { %p411_p7 = pneg %p410_p4  ;;  %p415_p10 = por %p414_p8, %p413_p5 }
  0x1b   : > { %p417_p0 = por %p416_p9, %p415_p10 }
  0x1d   : > { %p418_p1 = pnand %p417_p0, %p411_p7 }
  0x1f   : > { %421 = shalt.err (!%p418_p1)
}
  0x20   : > { %s422_s22 = scalar_lea.vmem %s600_s6, 128  ;;  %s505_s26 = smov [#allocation2]  }
  0x21   : > { %p423_p2 = scmp.ne.s32.totalorder %s600_s6, %s422_s22  ;;  %s427_s27 = sshll.u32 %s505_s26, 4  ;;  %s428_s27 = int_to_ptr.vmem [resolvable:$false] %s427_s27 }
  0x22   : > { %s429_s28 = scalar_lea.vmem %s428_s27, 256  ;;  %p430_p11 = scmp.lt.s32.totalorder %s600_s6, %s428_s27 }
  0x23   : > { %p425_p4 = pnand %p423_p2, %p409_p3  ;;  %p431_p5 = scmp.lt.s32.totalorder %s429_s28, %s422_s22 }
  0x25   : > { %p426_p12 = pneg %p425_p4  ;;  %p432_p8 = por %p431_p5, %p430_p11 }
  0x27   : > { %p433_p9 = pnand %p432_p8, %p426_p12 }
  0x29   : > { %436 = shalt.err (!%p433_p9)
}
  0x2a   : > { %366 = dma.hbm_to_vmem [thread:$0]  (!%p596_p13), %s592_s4, 128, %s600_s6, %s149_s8  }
  0x2b   : > { %p708_p0 = scmp.lt.s32.totalorder %s503_s15, 3  ;;  %p709_p1 = scmp.ge.s32.totalorder %s503_s15, 1 }
  0x2d   : > { %p172_p3 = pnand %p709_p1, %p708_p0 }
  0x2e   : > { %s634_s29 = sand.u32 (!%p172_p3), 1, %s495_s13  }
  0x2f   : > { %175 = sbr.rel (%p172_p3) target bundleno = 192 (0xc0), region = 32  ;;  %s351_s30 = sshll.u32 (!%p172_p3), %s634_s29, 3 }
  0x30   : > { %s178_s5 = scalar_lea.sflag (!%p172_p3), [#allocation3], %s634_s29  ;;  %s181_s9 = scalar_lea.vmem (!%p172_p3), [#allocation2], %s351_s30 }
  0x36   : > { %482 = dma.done.wait (%p572_p6), %s178_s5, 128  }
  0x37   : > { %484 = vsyncadd (%p572_p6), %s178_s5, 4294967168  ;;  %p212_p11 = scmp.lt.s32.totalorder %s550_s16, 1  ;;  %v221_v0 = vld [vmem:[%s181_s9] sm:$0xff]  ;;  %s506_s11 = smov 32   ;;  %vm231_vm0 = vcmask 261120   ;;  %vm233_vm1 = vcmask 392192  }
  0x38   : > { %224 = vrot.lane.b32.xlu0 %v221_v0, %s506_s11  ;;  %s507_s17 = smov 48   ;;  %s356_s22 = sshll.u32 %s550_s16, 7  ;;  %vm235_vm2 = vcmask 457728  }
  0x39   : > { %s213_s4 = scalar_select %p212_p11, %s550_s16, 1 }
  0x3a   : > { %s211_s26 = scalar_lea.vmem [#allocation5], %s351_s30  ;;  %s654_s9 = scalar_lea.hbm %s701_s3, %s356_s22 }
  0x3b   : > { %s353_s6 = sshll.u32 %s213_s4, 3  ;;  %s251_s27 = sshll.u32 %s211_s26, 4  ;;  %s656_s27 = int_to_ptr.vmem [resolvable:$true] %s251_s27 }
  0x3c   : > { %s219_s10 = scalar_lea.vmem %s700_s2, %s353_s6  ;;  %s215_s23 = scalar_lea.vmem %s698_s0, %s353_s6 }
  0x3d   : > { %v222_v1 = vld [vmem:[%s219_s10] sm:$0xff]  ;;  %s238_s4 = scalar_lea.sflag [#allocation4], %s634_s29  ;;  %s437_s16 = scalar_lea.vmem %s656_s27, 128 }
  0x3e   : > { %228 = vrot.lane.b32.xlu0 %v222_v1, %s507_s17  ;;  %v220_v3 = vld [vmem:[%s215_s23] sm:$0xff]  ;;  %p438_p6 = scmp.ne.s32.totalorder %s656_s27, %s437_s16  ;;  %p710_p12 = scmp.ne.s32.totalorder %s705_s24, 0 }
  0x3f   : > { %s508_s30 = smov [#allocation5]  }
  0x40   : > { %p439_p13 = pnand %p438_p6, %p710_p12  ;;  %s441_s6 = sshll.u32 %s508_s30, 4  ;;  %s442_s6 = int_to_ptr.vmem [resolvable:$false] %s441_s6 }
  0x41   : > { %s443_s7 = scalar_lea.vmem %s442_s6, 256  ;;  %p444_p10 = scmp.lt.s32.totalorder %s656_s27, %s442_s6 }
  0x42   : > { %p440_p7 = pneg %p439_p13  ;;  %p445_p2 = scmp.lt.s32.totalorder %s443_s7, %s437_s16 }
  0x44   : > { %p446_p4 = por %p445_p2, %p444_p10 }
  0x46   : > { %p447_p5 = pnand %p446_p4, %p440_p7 }
  0xaa   : > { %v225_v2 = vpop.permute.xlu0 %224 }
  0xab   : > { %v232_v4 = vsel %vm231_vm0, %v220_v3, %v225_v2 }
  0xb0   : > { %v229_v5 = vpop.permute.xlu0 %228 }
  0xb1   : > { %v234_v6 = vsel %vm233_vm1, %v232_v4, %v229_v5 }
  0xb2   : > { %236 = vst.msk [vmem:[%s211_s26] sm:$0xff] %vm235_vm2, %v234_v6 }
  0xb3   : > { %450 = shalt.err (!%p447_p5)
}
  0xb4   : > { %s451_s29 = scalar_lea.hbm %s654_s9, 128  ;;  %s455_s11 = scalar_lea.hbm %s701_s3, 256 }
  0xb5   : > { %p452_p8 = scmp.ne.s32.totalorder %s654_s9, %s451_s29  ;;  %p456_p1 = scmp.lt.u32.totalorder %s654_s9, %s701_s3 }
  0xb6   : > { %p457_p3 = scmp.lt.u32.totalorder %s455_s11, %s451_s29  ;;  %p459_p6 = scmp.lt.u32.totalorder %s451_s29, %s654_s9 }
  0xb7   : > { %p453_p9 = pnand %p452_p8, %p710_p12 }
  0xb8   : > { %p458_p11 = por %p457_p3, %p456_p1 }
  0xb9   : > { %p454_p0 = pneg %p453_p9 }
  0xba   : > { %p460_p13 = por %p459_p6, %p458_p11 }
  0xbc   : > { %p461_p7 = pnand %p460_p13, %p454_p0 }
  0xbe   : > { %464 = shalt.err (!%p461_p7)
}
  0xbf   : > { %361 = dma.vmem_to_hbm [thread:$0]  (%p710_p12), %s656_s27, 128, %s654_s9, %s238_s4  }
  0xc0 PF: > { %s263_s20 = sand.u32 1, %s491_s12   ;;  %p711_p10 = scmp.ne.s32.totalorder %s706_s25, 0 }
  0xc1   : > { %p712_p2 = scmp.ge.s32.totalorder %s503_s15, 2  ;;  %s264_s23 = scalar_lea.sflag [#allocation4], %s263_s20 }
  0xc3   : > { %p368_p4 = pnand %p712_p2, %p711_p10 }
  0xc5   : > { %486 = dma.done.wait (!%p368_p4), %s264_s23, 128  }
  0xc6   : > { %488 = vsyncadd (!%p368_p4), %s264_s23, 4294967168  ;;  %p16_p5 = scmp.ge.s32.totalorder %s554_s18, 4   ;;  %s713_s12 = smov %s495_s13 }
  0xc7   : > { %s714_s13 = smov %s499_s14  ;;  %s715_s14 = smov %s566_s21 }
  0xc8   : > { %s716_s15 = smov %s554_s18  ;;  %18 = sbr.rel (!%p16_p5) target bundleno = 5 (0x5), region = 83 }
  0xcf   :  { %269 = vsyncpa [#allocation3], 1 }
  0xd0   :  { %271 = vsyncpa [#allocation3 + $0x1], 1 }
  0xd1   :  { %272 = vsyncpa [#allocation4], 1 }
  0xd2   :  { %274 = vsyncpa [#allocation4 + $0x1], 1 }

</bundles_post_ra>
